<compile_context>
chip_gen: v5e
topology: v5e:2x2
jax: 0.10.0
libtpu: 0.0.40
codegen_flags: <defaults>
</compile_context>

<pallas_src>
import functools

import jax
import jax.numpy as jnp
from jax.experimental import pallas as pl
from jax.experimental.pallas import tpu as pltpu


# ----------------------------------------------------------------------------
# process_obs_fn: madrona_learn passes a user fn that flattens / concatenates
# raw observation tensors under torch.no_grad().  For a single obs this is a
# free reshape (view); the f32->bf16 cast happens *inside* the kernel.
# TODO(synk): for multi-obs inputs, fuse per-obs K-slices of W1 inside the
# kernel instead of concatenating here (concat materializes one [B, D] copy).
# ----------------------------------------------------------------------------
def process_obs(*in_obs):
    flat = [jnp.reshape(o, (o.shape[0], -1)) for o in in_obs]
    x = flat[0] if len(flat) == 1 else jnp.concatenate(flat, axis=-1)
    return jax.lax.stop_gradient(x)


# ----------------------------------------------------------------------------
# Fused 2-layer MLP kernel (the hot path of SmallMLPBackbone.net)
# ----------------------------------------------------------------------------
def _mlp_kernel(x_ref, w1_ref, b_ref, w2_ref, o_ref):
    x = x_ref[...].astype(jnp.bfloat16)                                # (tb, D) f32 -> bf16 in VMEM
    b = b_ref[...]                                                     # (2, C) f32
    h = jnp.dot(x, w1_ref[...], preferred_element_type=jnp.float32)    # (tb, C) f32 acc
    h = jnp.maximum(h + b[0:1, :], 0.0)                                # bias + ReLU
    h = h.astype(jnp.bfloat16)                                         # bf16 for MXU
    y = jnp.dot(h, w2_ref[...], preferred_element_type=jnp.float32)    # (tb, C) f32 acc
    y = jnp.maximum(y + b[1:2, :], 0.0)                                # bias + ReLU
    o_ref[...] = y.astype(o_ref.dtype)


def _round_up(x, m):
    return ((x + m - 1) // m) * m


def _vmem_limit_bytes(tile_b, D, C):
    # Double-buffered f32 x tile + f32 out tile + resident bf16 weights and
    # f32 biases (counted double-buffered, conservatively) + compiler scratch
    # headroom.  Capped at 48 MiB so it is safe on v7x's 64 MiB VMEM.
    need = 2 * tile_b * D * 4 + 2 * tile_b * C * 4
    need += 2 * (D * C * 2 + C * C * 2 + 2 * C * 4)
    need += 16 << 20
    return int(min(max(need, 32 << 20), 48 << 20))


@functools.partial(jax.jit, static_argnames=("tile_b",))
def _mlp_pallas(x, w1_t, b_packed, w2_t, *, tile_b=1024):
    """x: [B, D] f32; w1_t: [D, C] bf16; b_packed: [2, C] f32; w2_t: [C, C] bf16."""
    B, D = x.shape
    C = w1_t.shape[1]

    # Clamp tile: never bigger than (B rounded up to the 8-row sublane tile),
    # and ensure >= 2 grid steps whenever B permits so both v7x TensorCores
    # get work (harmless on v5e/v6e).
    tb = min(tile_b, _round_up(B, 8))
    if B > 8:
        tb = min(tb, _round_up(pl.cdiv(B, 2), 8))
    num_tiles = pl.cdiv(B, tb)   # partial last block handled by Pallas (no pad/slice)

    cost = pl.CostEstimate(
        flops=2 * B * (D * C + C * C),
        transcendentals=0,
        bytes_accessed=B * D * 4 + B * C * 4 + D * C * 2 + C * C * 2 + 2 * C * 4,
    )

    return pl.pallas_call(
        _mlp_kernel,
        out_shape=jax.ShapeDtypeStruct((B, C), jnp.float32),
        grid_spec=pltpu.PrefetchScalarGridSpec(
            num_scalar_prefetch=0,
            grid=(num_tiles,),
            in_specs=[
                pl.BlockSpec((tb, D), lambda i: (i, 0)),   # x tile (streamed, f32)
                pl.BlockSpec((D, C), lambda i: (0, 0)),    # W1^T (resident, bf16)
                pl.BlockSpec((2, C), lambda i: (0, 0)),    # [b1; b2] (resident, f32)
                pl.BlockSpec((C, C), lambda i: (0, 0)),    # W2^T (resident, bf16)
            ],
            out_specs=pl.BlockSpec((tb, C), lambda i: (i, 0)),
        ),
        compiler_params=pltpu.CompilerParams(
            dimension_semantics=("parallel",),
            vmem_limit_bytes=_vmem_limit_bytes(tb, D, C),
        ),
        cost_estimate=cost,
    )(x, w1_t, b_packed, w2_t)


def prepare_params(w1, b1, w2, b2):
    """PyTorch Linear weights are [out, in]; pre-transpose to [in, out] and cast
    to bf16 once.  Biases are packed into a single (2, C) f32 resident input."""
    return (
        jnp.transpose(w1).astype(jnp.bfloat16),
        jnp.stack([b1, b2], axis=0).astype(jnp.float32),
        jnp.transpose(w2).astype(jnp.bfloat16),
    )


def small_mlp_backbone_forward(params, *in_obs, tile_b=1024):
    x = process_obs(*in_obs)                       # [B, D] f32 view (no_grad)
    w1_t, b_packed, w2_t = params
    return _mlp_pallas(x, w1_t, b_packed, w2_t, tile_b=tile_b)


# ----------------------------------------------------------------------------
# Parameter init: mimic nn.Linear default (uniform +/- 1/sqrt(fan_in)),
# deterministic via PRNGKey.
# ----------------------------------------------------------------------------
def init_linear(key, fan_in, fan_out):
    kw, kb = jax.random.split(key)
    bound = 1.0 / jnp.sqrt(jnp.float32(fan_in))
    w = jax.random.uniform(kw, (fan_out, fan_in), jnp.float32, -bound, bound)
    b = jax.random.uniform(kb, (fan_out,), jnp.float32, -bound, bound)
    return w, b


if __name__ == "__main__":
    key = jax.random.PRNGKey(0)
    k_obs, k_l1, k_l2 = jax.random.split(key, 3)

    # Small, forward-consistent shapes:
    #   raw observation: [B=16, 4, 16, 16]  -> process_obs flattens to D=1024
    #   num_channels = 128
    B, Cc, H, W = 16, 4, 16, 16
    num_channels = 128
    input_dim = Cc * H * W

    obs = jax.random.normal(k_obs, (B, Cc, H, W), jnp.float32)

    w1, b1 = init_linear(k_l1, input_dim, num_channels)
    w2, b2 = init_linear(k_l2, num_channels, num_channels)
    params = prepare_params(w1, b1, w2, b2)

    out = small_mlp_backbone_forward(params, obs)
    out = jax.block_until_ready(out)

    # Plain-JAX reference of the same forward pass (mirror the kernel's bf16
    # input / hidden casts, f32 accumulate).
    x32 = process_obs(obs).astype(jnp.bfloat16).astype(jnp.float32)
    w1_32 = params[0].astype(jnp.float32)
    w2_32 = params[2].astype(jnp.float32)
    b1_32 = params[1][0:1, :]
    b2_32 = params[1][1:2, :]
    h = jnp.maximum(x32 @ w1_32 + b1_32, 0.0)
    h = h.astype(jnp.bfloat16).astype(jnp.float32)
    ref = jnp.maximum(h @ w2_32 + b2_32, 0.0)

    assert out.shape == (B, num_channels)
    assert out.dtype == jnp.float32
    assert jnp.allclose(out, ref, atol=3e-2, rtol=3e-2)

    print("KERNEL_OK")
</pallas_src>

<mosaic_0001>
module attributes {stable_mosaic.version = 11 : i64} {
  func.func @_mlp_kernel(%arg0: i32, %arg1: memref<8x1024xf32, #tpu.memory_space<vmem>>, %arg2: memref<1024x128xbf16, #tpu.memory_space<vmem>>, %arg3: memref<2x128xf32, #tpu.memory_space<vmem>>, %arg4: memref<128x128xbf16, #tpu.memory_space<vmem>>, %arg5: memref<8x128xf32, #tpu.memory_space<vmem>>) attributes {dimension_semantics = [#tpu.dimension_semantics<parallel>], iteration_bounds = array<i64: 2>, scalar_prefetch = 0 : i64, scratch_operands = 0 : i64, tpu.core_type = #tpu.core_type<tc>, window_params = [{transform_indices = @transform_0, window_bounds = array<i64: 8, 1024>}, {pipeline_mode = #tpu.pipeline_mode<synchronous>, transform_indices = @transform_1, window_bounds = array<i64: 1024, 128>}, {pipeline_mode = #tpu.pipeline_mode<synchronous>, transform_indices = @transform_2, window_bounds = array<i64: 2, 128>}, {pipeline_mode = #tpu.pipeline_mode<synchronous>, transform_indices = @transform_3, window_bounds = array<i64: 128, 128>}, {transform_indices = @transform_4, window_bounds = array<i64: 8, 128>}]} {
    %c0 = arith.constant 0 : index
    %c0_0 = arith.constant 0 : index
    %0 = vector.load %arg1[%c0, %c0_0] : memref<8x1024xf32, #tpu.memory_space<vmem>>, vector<8x1024xf32>
    %1 = arith.truncf %0 : vector<8x1024xf32> to vector<8x1024xbf16>
    %c0_1 = arith.constant 0 : index
    %c0_2 = arith.constant 0 : index
    %2 = vector.load %arg3[%c0_1, %c0_2] : memref<2x128xf32, #tpu.memory_space<vmem>>, vector<2x128xf32>
    %c0_3 = arith.constant 0 : index
    %c0_4 = arith.constant 0 : index
    %3 = vector.load %arg2[%c0_3, %c0_4] : memref<1024x128xbf16, #tpu.memory_space<vmem>>, vector<1024x128xbf16>
    %cst = arith.constant dense<0.000000e+00> : vector<8x128xf32>
    %4 = tpu.matmul %1, %3, %cst {dimension_numbers = #tpu.dot_dimension_numbers<[1], [0], [0], [1], [0, 0, 1, 1], [], []>} : vector<8x1024xbf16>, vector<1024x128xbf16>, vector<8x128xf32> -> vector<8x128xf32>
    %5 = vector.extract_strided_slice %2 {offsets = [0, 0], sizes = [1, 128], strides = [1, 1]} : vector<2x128xf32> to vector<1x128xf32>
    %6 = vector.broadcast %5 : vector<1x128xf32> to vector<8x128xf32>
    %7 = arith.addf %4, %6 : vector<8x128xf32>
    %cst_5 = arith.constant 0.000000e+00 : f32
    %8 = vector.broadcast %cst_5 : f32 to vector<8x128xf32>
    %9 = arith.maximumf %7, %8 : vector<8x128xf32>
    %10 = arith.truncf %9 : vector<8x128xf32> to vector<8x128xbf16>
    %c0_6 = arith.constant 0 : index
    %c0_7 = arith.constant 0 : index
    %11 = vector.load %arg4[%c0_6, %c0_7] : memref<128x128xbf16, #tpu.memory_space<vmem>>, vector<128x128xbf16>
    %cst_8 = arith.constant dense<0.000000e+00> : vector<8x128xf32>
    %12 = tpu.matmul %10, %11, %cst_8 {dimension_numbers = #tpu.dot_dimension_numbers<[1], [0], [0], [1], [0, 0, 1, 1], [], []>} : vector<8x128xbf16>, vector<128x128xbf16>, vector<8x128xf32> -> vector<8x128xf32>
    %13 = vector.extract_strided_slice %2 {offsets = [1, 0], sizes = [1, 128], strides = [1, 1]} : vector<2x128xf32> to vector<1x128xf32>
    %14 = vector.broadcast %13 : vector<1x128xf32> to vector<8x128xf32>
    %15 = arith.addf %12, %14 : vector<8x128xf32>
    %cst_9 = arith.constant 0.000000e+00 : f32
    %16 = vector.broadcast %cst_9 : f32 to vector<8x128xf32>
    %17 = arith.maximumf %15, %16 : vector<8x128xf32>
    %c0_10 = arith.constant 0 : index
    %c0_11 = arith.constant 0 : index
    %18 = vector.load %arg5[%c0_10, %c0_11] : memref<8x128xf32, #tpu.memory_space<vmem>>, vector<8x128xf32>
    tpu.vector_store %arg5[%c0_10, %c0_11], %17 {strides = array<i32>} : memref<8x128xf32, #tpu.memory_space<vmem>>, vector<8x128xf32>,
    return
  }
  func.func @transform_0(%arg0: i32) -> (i32, i32) {
    %c0_i32 = arith.constant 0 : i32
    %c0_i32_0 = arith.constant 0 : i32
    return %arg0, %c0_i32 : i32, i32
  }
  func.func @transform_1(%arg0: i32) -> (i32, i32) {
    %c0_i32 = arith.constant 0 : i32
    %c0_i32_0 = arith.constant 0 : i32
    %c0_i32_1 = arith.constant 0 : i32
    return %c0_i32, %c0_i32_0 : i32, i32
  }
  func.func @transform_2(%arg0: i32) -> (i32, i32) {
    %c0_i32 = arith.constant 0 : i32
    %c0_i32_0 = arith.constant 0 : i32
    %c0_i32_1 = arith.constant 0 : i32
    return %c0_i32, %c0_i32_0 : i32, i32
  }
  func.func @transform_3(%arg0: i32) -> (i32, i32) {
    %c0_i32 = arith.constant 0 : i32
    %c0_i32_0 = arith.constant 0 : i32
    %c0_i32_1 = arith.constant 0 : i32
    return %c0_i32, %c0_i32_0 : i32, i32
  }
  func.func @transform_4(%arg0: i32) -> (i32, i32) {
    %c0_i32 = arith.constant 0 : i32
    %c0_i32_0 = arith.constant 0 : i32
    return %arg0, %c0_i32 : i32, i32
  }
}

</mosaic_0001>

<bundles_post_ra>
// kernel: _mlp_pallas.1
= control target key start
LH: loop header
LB: loop body
LE: loop exit
PB: predicated region body
PF: predicated region fallthrough
CT: control target
= control target key end

     0   :  { %9 = vsyncpa [#allocation3], 0  ;;  %s1947_s0 = inlined_call_operand.hbm [shape: f32[16,1024], index: 0, kind: input, shape index: {}]   ;;  %s1948_s1 = inlined_call_operand.hbm [shape: bf16[1024,128], index: 1, kind: input, shape index: {}]   ;;  %s1949_s2 = inlined_call_operand.hbm [shape: f32[2,128], index: 2, kind: input, shape index: {}]   ;;  %s1950_s3 = inlined_call_operand.hbm [shape: bf16[128,128], index: 3, kind: input, shape index: {}]   ;;  %s1951_s4 = inlined_call_operand.hbm [shape: f32[16,128], index: 4, kind: output, shape index: {}]  }
   0x1   :  { %11 = vsyncpa [#allocation3 + $0x1], 0 }
   0x2   :  { %12 = vsyncpa [#allocation6], 0 }
   0x3   :  { %13 = vsyncpa [#allocation9], 0 }
   0x4   :  { %14 = vsyncpa [#allocation4], 0 }
   0x5   :  { %16 = vsyncpa [#allocation4 + $0x1], 0  ;;  %s1780_s15 = smov 0   ;;  %s1782_s16 = smov 0  }
   0x6   :  { %s1784_s17 = smov 0   ;;  %s1786_s18 = smov 0  }
   0x7 LB: > { %s153_s21 = sshll.u32 %s1948_s1, 4  ;;  %s1804_s22 = sadd.s32 4294967295, %s1748_s18   ;;  %s1748_s18 = sphi %s1786_s18, %s1962_s18   ;;  %s1744_s17 = sphi %s1784_s17, %s1961_s17   ;;  %s1740_s16 = sphi %s1782_s16, %s1960_s16   ;;  %s1736_s15 = sphi %s1780_s15, %s1959_s15   ;;  %s154_s21 = int_to_ptr.hbm [resolvable:$true] %s153_s21 }
   0x8   : > { %p1096_p0 = scmp.ge.s32.totalorder %s1748_s18, 1  ;;  %p43_p1 = scmp.eq.s32.totalorder %s1804_s22, 0 }
   0x9   : > { %p142_p2 = scmp.lt.s32.totalorder %s1748_s18, 3  ;;  %s1750_s24 = smov [#allocation5]  }
   0xa   : > { %s155_s25 = sshll.u32 %s1750_s24, 4  ;;  %s168_s28 = sshll.u32 %s1949_s2, 4  ;;  %s156_s25 = int_to_ptr.vmem [resolvable:$true] %s155_s25  ;;  %s169_s28 = int_to_ptr.hbm [resolvable:$true] %s168_s28 }
   0xb   : > { %p1809_p3 = pnand %p1096_p0, %p142_p2  ;;  %s179_s6 = sshll.u32 %s1950_s3, 4  ;;  %s180_s6 = int_to_ptr.hbm [resolvable:$true] %s179_s6 }
   0xc   : > { %s1751_s7 = smov [#allocation7]   ;;  %s1752_s9 = smov 64  }
   0xd   : > { %p1491_p4 = pneg %p1809_p3  ;;  %s170_s8 = sshll.u32 %s1751_s7, 4  ;;  %s171_s8 = int_to_ptr.vmem [resolvable:$true] %s170_s8 }
   0xe   : > { %s1753_s10 = smov 4   ;;  %s1754_s11 = smov [#allocation8]  }
   0xf   : > { %p1821_p6 = pnand %p1491_p4, %p43_p1  ;;  %s181_s12 = sshll.u32 %s1754_s11, 4  ;;  %s182_s12 = int_to_ptr.vmem [resolvable:$true] %s181_s12 }
  0x10   : > { %s1095_s13 = sadd.s32 4294967294, %s1748_s18   ;;  %s1836_s14 = sadd.s32 1, %s1748_s18  }
  0x11   : > { %1494 = dma.hbm_to_vmem [thread:$0]  (!%p1821_p6), %s154_s21, 8192, %s156_s25, [#allocation6], %s1752_s9, %s1752_s9, %s1753_s10  }
  0x12   : > { %1497 = dma.hbm_to_vmem [thread:$0]  (!%p1821_p6), %s169_s28, 32, %s171_s8, [#allocation6]  }
  0x13   : > { %1500 = dma.hbm_to_vmem [thread:$0]  (!%p1821_p6), %s180_s6, 1024, %s182_s12, [#allocation9], %s1752_s9, %s1752_s9, %s1753_s10  }
  0x14   : > { %s29_s19 = sadd.s32 1, %s1744_s17  ;;  %s26_s20 = ssub.s32 %s1748_s18, %s1836_s14 }
  0x15   : > { %p36_p7 = scmp.ne.s32.totalorder %s1744_s17, %s1740_s16  ;;  %p27_p8 = scmp.eq.s32.totalorder %s26_s20, 0 }
  0x16   : > { %p37_p9 = scmp.eq.s32.totalorder %s1748_s18, 0  ;;  %p42_p10 = scmp.ne.s32.totalorder %s1740_s16, %s1736_s15 }
  0x17   : > { %p129_p11 = scmp.eq.s32.totalorder %s1804_s22, 1  ;;  %p135_p0 = scmp.eq.s32.totalorder %s1095_s13, 1 }
  0x18   : > { %s1848_s21 = scalar_select %p27_p8, %s1744_s17, %s29_s19  }
  0x19   : > { %p1852_p12 = por %p43_p1, %p42_p10  ;;  %p1856_p13 = por %p129_p11, %p36_p7 }
  0x1a   : > { %p38_p2 = por %p37_p9, %p36_p7  ;;  %s195_s26 = sand.u32 1, %s1744_s17  }
  0x1b   : > { %p1861_p4 = por %p135_p0, %p42_p10  ;;  %p1512_p6 = scmp.lt.s32.totalorder %s1748_s18, 2 }
  0x1c   : > { %s1101_s28 = sshll.u32 %s195_s26, 6  ;;  %s1402_s29 = sshll.u32 %s1748_s18, 6 }
  0x1d   : > { %s204_s6 = scalar_lea.hbm %s1947_s0, %s1402_s29  ;;  %s199_s8 = scalar_lea.vmem [#allocation2], %s1101_s28 }
  0x1e   : > { %s206_s7 = sshll.u32 %s204_s6, 4  ;;  %s208_s9 = sshll.u32 %s199_s8, 4  ;;  %s207_s7 = int_to_ptr.hbm [resolvable:$true] %s206_s7  ;;  %s209_s9 = int_to_ptr.vmem [resolvable:$true] %s208_s9 }
  0x1f   : > { %p1870_p8 = pnand %p1512_p6, %p38_p2  ;;  %s196_s11 = scalar_lea.sflag [#allocation3], %s195_s26 }
  0x20   : > { %s1644_s12 = sshra.s32 %s207_s7, 4  ;;  %s1651_s28 = scalar_lea.hbm %s1947_s0, 128  ;;  %s1645_s12 = int_to_ptr.hbm [resolvable:$true] %s1644_s12 }
  0x21   : > { %s1646_s13 = scalar_lea.hbm %s1645_s12, 64  ;;  %p1648_p9 = pneg %p1870_p8 }
  0x22   : > { %p1647_p7 = scmp.ne.s32.totalorder %s1645_s12, %s1646_s13  ;;  %p1652_p0 = scmp.lt.s32.totalorder %s1645_s12, %s1947_s0 }
  0x23   : > { %p1653_p2 = scmp.lt.s32.totalorder %s1651_s28, %s1646_s13 }
  0x24   : > { %p1649_p10 = pnand %p1648_p9, %p1647_p7 }
  0x25   : > { %p1654_p6 = por %p1653_p2, %p1652_p0 }
  0x26   : > { %p1650_p11 = pneg %p1649_p10 }
  0x28   : > { %p1655_p5 = pnand %p1654_p6, %p1650_p11 }
  0x2a   : > { %1658 = shalt.err (!%p1655_p5)
}
  0x2b   : > { %1504 = dma.hbm_to_vmem [thread:$0]  (!%p1870_p8), %s207_s7, 1024, %s209_s9, %s196_s11  }
  0x2c   : > { %217 = sbr.rel (%p1809_p3) target bundleno = 394 (0x18a), region = 36  ;;  %s1887_s26 = sand.u32 (!%p1809_p3), 1, %s1740_s16  }
  0x2d   : > { %s1105_s5 = sshll.u32 (!%p1809_p3), %s1887_s26, 6  ;;  %s220_s6 = scalar_lea.sflag (!%p1809_p3), [#allocation3], %s1887_s26 }
  0x2e   : > { %s1891_s8 = scalar_lea.vmem (!%p1809_p3), [#allocation2], %s1105_s5 }
  0x31   : > { %1719 = dma.done.wait (%p1852_p12), %s220_s6, 1024  }
  0x32   : > { %1721 = vsyncadd (%p1852_p12), %s220_s6, 4294966272 }
  0x33   : > { %1723 = dma.done.wait (%p43_p1), [#allocation6], 8224  }
  0x34   : > { %1725 = vsyncadd (%p43_p1), [#allocation6], 4294959072 }
  0x35   : > { %1727 = dma.done.wait (%p43_p1), [#allocation9], 1024  }
  0x36   : > { %1729 = vsyncadd (%p43_p1), [#allocation9], 4294966272  ;;  %v1410_v0 = vld [vmem:[#allocation5 + $0x38] sm:$0xff]  ;;  %v1409_v4 = vld [vmem:[#allocation5 + $0x30] sm:$0xff]  ;;  %s1109_s23 = sshll.u32 %s1887_s26, 3  ;;  %s1399_s24 = sshll.u32 %s1804_s22, 3 }
  0x37   : > { %v1418_v1 = vld [vmem:[#allocation5 + $0x78] sm:$0xff]  ;;  %794 = vmatpush.bf16.msra.mxu0 %v1410_v0  ;;  %v1417_v5 = vld [vmem:[#allocation5 + $0x70] sm:$0xff]  ;;  %v1408_v8 = vld [vmem:[#allocation5 + $0x28] sm:$0xff]  ;;  %s991_s10 = scalar_lea.hbm %s1951_s4, %s1399_s24  ;;  %s263_s11 = scalar_lea.vmem [#allocation10], %s1109_s23 }
  0x38   : > { %v1426_v2 = vld [vmem:[#allocation5 + $0xb8] sm:$0xff]  ;;  %807 = vmatpush.bf16.msra.mxu1 %v1418_v1  ;;  %v1425_v6 = vld [vmem:[#allocation5 + $0xb0] sm:$0xff]  ;;  %v1416_v9 = vld [vmem:[#allocation5 + $0x68] sm:$0xff]  ;;  %s993_s12 = sshll.u32 %s263_s11, 4  ;;  %s995_s13 = sshll.u32 %s991_s10, 4  ;;  %s994_s12 = int_to_ptr.vmem [resolvable:$true] %s993_s12  ;;  %s996_s13 = int_to_ptr.hbm [resolvable:$true] %s995_s13 }
  0x39   : > { %v1434_v3 = vld [vmem:[#allocation5 + $0xf8] sm:$0xff]  ;;  %820 = vmatpush.bf16.msra.mxu2 %v1426_v2  ;;  %v1433_v7 = vld [vmem:[#allocation5 + $0xf0] sm:$0xff]  ;;  %v1424_v10 = vld [vmem:[#allocation5 + $0xa8] sm:$0xff]  ;;  %s981_s19 = scalar_lea.sflag [#allocation4], %s1887_s26  ;;  %s1688_s20 = sshra.s32 %s996_s13, 4  ;;  %s1689_s20 = int_to_ptr.hbm [resolvable:$true] %s1688_s20 }
  0x3a   : > { %833 = vmatpush.bf16.msra.mxu3 %v1434_v3  ;;  %v1432_v11 = vld [vmem:[#allocation5 + $0xe8] sm:$0xff]  ;;  %v1407_v12 = vld [vmem:[#allocation5 + $0x20] sm:$0xff]  ;;  %v1406_v16 = vld [vmem:[#allocation5 + $0x18] sm:$0xff]  ;;  %s1690_s28 = scalar_lea.hbm %s1689_s20, 8  ;;  %s1694_s30 = scalar_lea.hbm %s1951_s4, 16 }
  0x3b   : > { %795 = vmatpush.bf16.msra.mxu0 %v1409_v4  ;;  %v1415_v13 = vld [vmem:[#allocation5 + $0x60] sm:$0xff]  ;;  %v1414_v17 = vld [vmem:[#allocation5 + $0x58] sm:$0xff]  ;;  %v1405_v20 = vld [vmem:[#allocation5 + $0x10] sm:$0xff]  ;;  %p1691_p1 = scmp.ne.s32.totalorder %s1689_s20, %s1690_s28  ;;  %p1695_p12 = scmp.lt.s32.totalorder %s1689_s20, %s1951_s4 }
  0x3c   : > { %808 = vmatpush.bf16.msra.mxu1 %v1417_v5  ;;  %v1423_v14 = vld [vmem:[#allocation5 + $0xa0] sm:$0xff]  ;;  %v1422_v18 = vld [vmem:[#allocation5 + $0x98] sm:$0xff]  ;;  %v1413_v21 = vld [vmem:[#allocation5 + $0x50] sm:$0xff]  ;;  %p1696_p8 = scmp.lt.s32.totalorder %s1694_s30, %s1690_s28 }
  0x3d   : > { %821 = vmatpush.bf16.msra.mxu2 %v1425_v6  ;;  %v1431_v15 = vld [vmem:[#allocation5 + $0xe0] sm:$0xff]  ;;  %v1430_v19 = vld [vmem:[#allocation5 + $0xd8] sm:$0xff]  ;;  %v1421_v22 = vld [vmem:[#allocation5 + $0x90] sm:$0xff]  ;;  %p1692_p3 = pnand %p1691_p1, %p1856_p13 }
  0x3e   : > { %834 = vmatpush.bf16.msra.mxu3 %v1433_v7  ;;  %v1429_v23 = vld [vmem:[#allocation5 + $0xd0] sm:$0xff]  ;;  %v1404_v24 = vld [vmem:[#allocation5 + $0x8] sm:$0xff]  ;;  %v1403_v28 = vld [vmem:[#allocation5] sm:$0xff]  ;;  %p1697_p7 = por %p1696_p8, %p1695_p12 }
  0x3f   : > { %796 = vmatpush.bf16.msra.mxu0 %v1408_v8  ;;  %v1412_v25 = vld [vmem:[#allocation5 + $0x48] sm:$0xff]  ;;  %v1411_v29 = vld [vmem:[#allocation5 + $0x40] sm:$0xff]  ;;  %v1442_v32 = vld [vmem:[#allocation5 + $0x138] sm:$0xff]  ;;  %p1693_p5 = pneg %p1692_p3 }
  0x40   : > { %809 = vmatpush.bf16.msra.mxu1 %v1416_v9  ;;  %v1420_v26 = vld [vmem:[#allocation5 + $0x88] sm:$0xff]  ;;  %v1419_v30 = vld [vmem:[#allocation5 + $0x80] sm:$0xff]  ;;  %v266_v33 = vld [vmem:[%s1891_s8 + $0x10] sm:$0xff] }
  0x41   : > { %822 = vmatpush.bf16.msra.mxu2 %v1424_v10  ;;  %v1428_v27 = vld [vmem:[#allocation5 + $0xc8] sm:$0xff]  ;;  %v1427_v31 = vld [vmem:[#allocation5 + $0xc0] sm:$0xff]  ;;  %v1450_v35 = vld [vmem:[#allocation5 + $0x178] sm:$0xff]  ;;  %v274_v40 = vpack.c.bf16 %v266_v33, %v266_v33  ;;  %p1698_p9 = pnand %p1697_p7, %p1693_p5 }
  0x42   : > { %835 = vmatpush.bf16.msra.mxu3 %v1432_v11  ;;  %v264_v34 = vld [vmem:[%s1891_s8] sm:$0xff]  ;;  %v267_v36 = vld [vmem:[%s1891_s8 + $0x18] sm:$0xff]  ;;  %v265_v37 = vld [vmem:[%s1891_s8 + $0x8] sm:$0xff] }
  0x43   : > { %797 = vmatpush.bf16.msra.mxu0 %v1407_v12  ;;  %v1458_v38 = vld [vmem:[#allocation5 + $0x1b8] sm:$0xff]  ;;  %v272_v41 = vpack.c.bf16 %v264_v34, %v264_v34  ;;  %v275_v42 = vpack.c.bf16 %v267_v36, %v267_v36  ;;  %v273_v43 = vpack.c.bf16 %v265_v37, %v265_v37  ;;  %v1441_v44 = vld [vmem:[#allocation5 + $0x130] sm:$0xff]  ;;  %v1440_v48 = vld [vmem:[#allocation5 + $0x128] sm:$0xff] }
  0x44   : > { %810 = vmatpush.bf16.msra.mxu1 %v1415_v13  ;;  %v1466_v39 = vld [vmem:[#allocation5 + $0x1f8] sm:$0xff]  ;;  %v1449_v45 = vld [vmem:[#allocation5 + $0x170] sm:$0xff]  ;;  %v1448_v49 = vld [vmem:[#allocation5 + $0x168] sm:$0xff] }
  0x45   : > { %823 = vmatpush.bf16.msra.mxu2 %v1423_v14  ;;  %v1457_v46 = vld [vmem:[#allocation5 + $0x1b0] sm:$0xff]  ;;  %v1456_v50 = vld [vmem:[#allocation5 + $0x1a8] sm:$0xff]  ;;  %v1439_v52 = vld [vmem:[#allocation5 + $0x120] sm:$0xff] }
  0x46   : > { %836 = vmatpush.bf16.msra.mxu3 %v1431_v15  ;;  %v1465_v47 = vld [vmem:[#allocation5 + $0x1f0] sm:$0xff]  ;;  %v1464_v51 = vld [vmem:[#allocation5 + $0x1e8] sm:$0xff]  ;;  %v1447_v53 = vld [vmem:[#allocation5 + $0x160] sm:$0xff] }
  0x47   : > { %798 = vmatpush.bf16.msra.mxu0 %v1406_v16  ;;  %v1455_v54 = vld [vmem:[#allocation5 + $0x1a0] sm:$0xff]  ;;  %v1438_v56 = vld [vmem:[#allocation5 + $0x118] sm:$0xff]  ;;  %v1437_v60 = vld [vmem:[#allocation5 + $0x110] sm:$0xff] }
  0x48   : > { %811 = vmatpush.bf16.msra.mxu1 %v1414_v17  ;;  %v1463_v55 = vld [vmem:[#allocation5 + $0x1e0] sm:$0xff]  ;;  %v1446_v57 = vld [vmem:[#allocation5 + $0x158] sm:$0xff]  ;;  %v1445_v61 = vld [vmem:[#allocation5 + $0x150] sm:$0xff] }
  0x49   : > { %824 = vmatpush.bf16.msra.mxu2 %v1422_v18  ;;  %v1454_v58 = vld [vmem:[#allocation5 + $0x198] sm:$0xff]  ;;  %v1453_v62 = vld [vmem:[#allocation5 + $0x190] sm:$0xff]  ;;  %v1436_v0 = vld [vmem:[#allocation5 + $0x108] sm:$0xff] }
  0x4a   : > { %837 = vmatpush.bf16.msra.mxu3 %v1430_v19  ;;  %v1462_v59 = vld [vmem:[#allocation5 + $0x1d8] sm:$0xff]  ;;  %v1461_v63 = vld [vmem:[#allocation5 + $0x1d0] sm:$0xff]  ;;  %v1444_v1 = vld [vmem:[#allocation5 + $0x148] sm:$0xff] }
  0x4b   : > { %799 = vmatpush.bf16.msra.mxu0 %v1405_v20  ;;  %v1452_v2 = vld [vmem:[#allocation5 + $0x188] sm:$0xff]  ;;  %v1435_v4 = vld [vmem:[#allocation5 + $0x100] sm:$0xff]  ;;  %v270_v10 = vld [vmem:[%s1891_s8 + $0x30] sm:$0xff] }
  0x4c   : > { %812 = vmatpush.bf16.msra.mxu1 %v1413_v21  ;;  %v1460_v3 = vld [vmem:[#allocation5 + $0x1c8] sm:$0xff]  ;;  %v1443_v5 = vld [vmem:[#allocation5 + $0x140] sm:$0xff]  ;;  %v271_v11 = vld [vmem:[%s1891_s8 + $0x38] sm:$0xff]  ;;  %v278_v14 = vpack.c.bf16 %v270_v10, %v270_v10 }
  0x4d   : > { %825 = vmatpush.bf16.msra.mxu2 %v1421_v22  ;;  %v1451_v6 = vld [vmem:[#allocation5 + $0x180] sm:$0xff]  ;;  %v269_v8 = vld [vmem:[%s1891_s8 + $0x28] sm:$0xff]  ;;  %v279_v15 = vpack.c.bf16 %v271_v11, %v271_v11  ;;  %v1473_v17 = vld [vmem:[#allocation8 + $0x30] sm:$0xff] }
  0x4e   : > { %838 = vmatpush.bf16.msra.mxu3 %v1429_v23  ;;  %v268_v7 = vld [vmem:[%s1891_s8 + $0x20] sm:$0xff]  ;;  %v277_v13 = vpack.c.bf16 %v269_v8, %v269_v8  ;;  %v1472_v18 = vld [vmem:[#allocation8 + $0x28] sm:$0xff]  ;;  %v1469_v22 = vld [vmem:[#allocation8 + $0x10] sm:$0xff] }
  0x4f   : > { %800 = vmatpush.bf16.msra.mxu0 %v1404_v24  ;;  %v1459_v9 = vld [vmem:[#allocation5 + $0x1c0] sm:$0xff]  ;;  %v276_v12 = vpack.c.bf16 %v268_v7, %v268_v7  ;;  %v1468_v24 = vld [vmem:[#allocation8 + $0x8] sm:$0xff] }
  0x50   : > { %813 = vmatpush.bf16.msra.mxu1 %v1412_v25  ;;  %v1474_v16 = vld [vmem:[#allocation8 + $0x38] sm:$0xff]  ;;  %v1471_v19 = vld [vmem:[#allocation8 + $0x20] sm:$0xff] }
  0x51   : > { %826 = vmatpush.bf16.msra.mxu2 %v1420_v26  ;;  %v1470_v20 = vld [vmem:[#allocation8 + $0x18] sm:$0xff] }
  0x52   : > { %839 = vmatpush.bf16.msra.mxu3 %v1428_v27 }
  0x53   : > { %801 = vmatpush.bf16.msra.mxu0 %v1403_v28  ;;  %v1467_v28 = vld [vmem:[#allocation8] sm:$0xff] }
  0x54   : > { %814 = vmatpush.bf16.msra.mxu1 %v1411_v29 }
  0x55   : > { %827 = vmatpush.bf16.msra.mxu2 %v1419_v30  ;;  %v280_v30 = vld [vmem:[#allocation7] sm:$0x3] }
  0x56   : > { %840 = vmatpush.bf16.msra.mxu3 %v1427_v31  ;;  %802 = vmatmul.bf16.vlgmr.msra.gmra.mxu0 %v272_v41  ;;  %v409_v31 = vperm.slane %v280_v30, 0 }
  0x57   : > { %846 = vmatpush.bf16.msrb.mxu0 %v1442_v32  ;;  %815 = vmatmul.bf16.vlgmr.msra.gmra.mxu1 %v273_v43 }
  0x58   : > { %859 = vmatpush.bf16.msrb.mxu1 %v1450_v35  ;;  %828 = vmatmul.bf16.vlgmr.msra.gmra.mxu2 %v274_v40 }
  0x59   : > { %872 = vmatpush.bf16.msrb.mxu2 %v1458_v38  ;;  %841 = vmatmul.bf16.vlgmr.msra.gmra.mxu3 %v275_v42 }
  0x5a   : > { %885 = vmatpush.bf16.msrb.mxu3 %v1466_v39 }
  0x5b   : > { %847 = vmatpush.bf16.msrb.mxu0 %v1441_v44 }
  0x5c   : > { %860 = vmatpush.bf16.msrb.mxu1 %v1449_v45 }
  0x5d   : > { %873 = vmatpush.bf16.msrb.mxu2 %v1457_v46 }
  0x5e   : > { %886 = vmatpush.bf16.msrb.mxu3 %v1465_v47 }
  0x5f   : > { %848 = vmatpush.bf16.msrb.mxu0 %v1440_v48 }
  0x60   : > { %861 = vmatpush.bf16.msrb.mxu1 %v1448_v49 }
  0x61   : > { %874 = vmatpush.bf16.msrb.mxu2 %v1456_v50 }
  0x62   : > { %887 = vmatpush.bf16.msrb.mxu3 %v1464_v51 }
  0x63   : > { %849 = vmatpush.bf16.msrb.mxu0 %v1439_v52  ;;  %v916_v52 = vperm.slane %v280_v30, 1 }
  0x64   : > { %862 = vmatpush.bf16.msrb.mxu1 %v1447_v53 }
  0x65   : > { %875 = vmatpush.bf16.msrb.mxu2 %v1455_v54 }
  0x66   : > { %888 = vmatpush.bf16.msrb.mxu3 %v1463_v55 }
  0x67   : > { %850 = vmatpush.bf16.msrb.mxu0 %v1438_v56 }
  0x68   : > { %863 = vmatpush.bf16.msrb.mxu1 %v1446_v57 }
  0x69   : > { %876 = vmatpush.bf16.msrb.mxu2 %v1454_v58 }
  0x6a   : > { %889 = vmatpush.bf16.msrb.mxu3 %v1462_v59 }
  0x6b   : > { %851 = vmatpush.bf16.msrb.mxu0 %v1437_v60 }
  0x6c   : > { %864 = vmatpush.bf16.msrb.mxu1 %v1445_v61 }
  0x6d   : > { %877 = vmatpush.bf16.msrb.mxu2 %v1453_v62 }
  0x6e   : > { %890 = vmatpush.bf16.msrb.mxu3 %v1461_v63 }
  0x6f   : > { %852 = vmatpush.bf16.msrb.mxu0 %v1436_v0 }
  0x70   : > { %865 = vmatpush.bf16.msrb.mxu1 %v1444_v1 }
  0x71   : > { %878 = vmatpush.bf16.msrb.mxu2 %v1452_v2 }
  0x72   : > { %891 = vmatpush.bf16.msrb.mxu3 %v1460_v3 }
  0x73   : > { %853 = vmatpush.bf16.msrb.mxu0 %v1435_v4 }
  0x74   : > { %866 = vmatpush.bf16.msrb.mxu1 %v1443_v5 }
  0x75   : > { %879 = vmatpush.bf16.msrb.mxu2 %v1451_v6 }
  0x76   : > { %892 = vmatpush.bf16.msrb.mxu3 %v1459_v9  ;;  %854 = vmatmul.bf16.vlgmr.msrb.gmra.mxu0 %v276_v12 }
  0x77   : > { %867 = vmatmul.bf16.vlgmr.msrb.gmra.mxu1 %v277_v13  ;;  %965 = vmatpush.bf16.msra.mxu0 %v1474_v16 }
  0x78   : > { %880 = vmatmul.bf16.vlgmr.msrb.gmra.mxu2 %v278_v14 }
  0x79   : > { %893 = vmatmul.bf16.vlgmr.msrb.gmra.mxu3 %v279_v15 }
  0x7b   : > { %966 = vmatpush.bf16.msra.mxu0 %v1473_v17 }
  0x7f   : > { %967 = vmatpush.bf16.msra.mxu0 %v1472_v18 }
  0x83   : > { %968 = vmatpush.bf16.msra.mxu0 %v1471_v19 }
  0x87   : > { %969 = vmatpush.bf16.msra.mxu0 %v1470_v20 }
  0x8b   : > { %970 = vmatpush.bf16.msra.mxu0 %v1469_v22 }
  0x8f   : > { %971 = vmatpush.bf16.msra.mxu0 %v1468_v24 }
  0x93   : > { %972 = vmatpush.bf16.msra.mxu0 %v1467_v28 }
  0xd3   : > { %v803_v21 = vpop.f32.mrf.mxu0 }
  0xd4   : > { %v816_v23 = vpop.f32.mrf.mxu1  ;;  %v804_v34 = vadd.f32 %v803_v21, %v409_v31 }
  0xd6   : > { %v817_v35 = vadd.f32 %v816_v23, %v804_v34 }
  0xdb   : > { %v829_v25 = vpop.f32.mrf.mxu2  ;;  %v805_v27 = vpop.f32.mrf.mxu0 }
  0xdc   : > { %v842_v26 = vpop.f32.mrf.mxu3  ;;  %v818_v29 = vpop.f32.mrf.mxu1  ;;  %v830_v36 = vadd.f32 %v829_v25, %v817_v35 }
  0xde   : > { %v843_v37 = vadd.f32 %v842_v26, %v830_v36 }
  0xe3   : > { %v831_v32 = vpop.f32.mrf.mxu2 }
  0xe4   : > { %v844_v33 = vpop.f32.mrf.mxu3 }
  0xf3   : > { %v855_v38 = vpop.f32.mrf.mxu0 }
  0xf4   : > { %v868_v39 = vpop.f32.mrf.mxu1  ;;  %v856_v40 = vadd.f32 %v855_v38, %v843_v37 }
  0xf6   : > { %v869_v41 = vadd.f32 %v868_v39, %v856_v40 }
  0xfb   : > { %v881_v42 = vpop.f32.mrf.mxu2  ;;  %v857_v45 = vpop.f32.mrf.mxu0 }
  0xfc   : > { %v894_v43 = vpop.f32.mrf.mxu3  ;;  %v882_v44 = vadd.f32 %v881_v42, %v869_v41  ;;  %v870_v46 = vpop.f32.mrf.mxu1 }
  0xfe   : > { %v895_v47 = vadd.f32 %v894_v43, %v882_v44 }
 0x100   : > { %v898_v48 = vmax.f32 %v895_v47, 0.0 }
 0x102   : > { %v899_v49 = vpack.c.bf16 %v898_v48, %v898_v48 }
 0x103   : > { %v883_v50 = vpop.f32.mrf.mxu2 }
 0x104   : > { %v896_v51 = vpop.f32.mrf.mxu3  ;;  %973 = vmatmul.bf16.vlgmr.msra.gmra.mxu0 %v899_v49 }
 0x181   : > { %v974_v53 = vpop.f32.mrf.mxu0 }
 0x182   : > { %v975_v54 = vadd.f32 %v974_v53, %v916_v52 }
 0x184   : > { %v978_v55 = vmax.f32 %v975_v54, 0.0 }
 0x186   : > { %979 = vst [vmem:[%s263_s11] sm:$0xff] %v978_v55 }
 0x187   : > { %1701 = shalt.err (!%p1698_p9)
}
 0x188   : > { %1489 = dma.vmem_to_hbm [thread:$0]  (%p1856_p13), %s994_s12, 128, %s996_s13, %s981_s19  }
 0x189   : > { %v976_v56 = vpop.f32.mrf.mxu0 }
 0x18a PF: > { %s1007_s26 = sand.u32 1, %s1736_s15   ;;  %p1958_p10 = scmp.ge.s32.totalorder %s1748_s18, 2 }
 0x18b   : > { %s1008_s8 = scalar_lea.sflag [#allocation4], %s1007_s26 }
 0x18c   : > { %p1506_p11 = pnand %p1958_p10, %p1861_p4 }
 0x18e   : > { %p1507_p0 = pneg %p1506_p11 }
 0x190   : > { %1731 = dma.done.wait (%p1507_p0), %s1008_s8, 128  }
 0x191   : > { %1733 = vsyncadd (%p1507_p0), %s1008_s8, 4294967168  ;;  %p19_p2 = scmp.ge.s32.totalorder %s1836_s14, 4   ;;  %s1959_s15 = smov %s1740_s16 }
 0x192   : > { %s1960_s16 = smov %s1744_s17  ;;  %s1961_s17 = smov %s1848_s21 }
 0x193   : > { %s1962_s18 = smov %s1836_s14  ;;  %21 = sbr.rel (!%p19_p2) target bundleno = 7 (0x7), region = 93 }
 0x198   :  { %1014 = vsyncpa [#allocation3], 1 }
 0x199   :  { %1016 = vsyncpa [#allocation3 + $0x1], 1 }
 0x19a   :  { %1017 = vsyncpa [#allocation6], 1 }
 0x19b   :  { %1018 = vsyncpa [#allocation9], 1 }
 0x19c   :  { %1019 = vsyncpa [#allocation4], 1 }
 0x19d   :  { %1021 = vsyncpa [#allocation4 + $0x1], 1 }

</bundles_post_ra>
